<compile_context>
chip_gen: v5e
topology: v5e:2x2
jax: 0.10.0
libtpu: 0.0.40
codegen_flags: <defaults>
</compile_context>

<pallas_src>
import jax
import jax.numpy as jnp
from jax.experimental import pallas as pl
from jax.experimental.pallas import tpu as pltpu


def affine_flow_kernel(mu_ref, scale_ref, z_ref, x_ref):
    # x = mu + scale * z  (scale = exp(log_sigma), precomputed in the wrapper).
    # Pure VPU FMA on a lane-dense tile; scalars live in SMEM.
    mu = mu_ref[0]
    scale = scale_ref[0]
    x_ref[...] = (mu + scale * z_ref[...]).astype(x_ref.dtype)


def affine_flow_forward(z, mu, log_sigma, *, slab_cols=2048,
                        target_tile_bytes=2 << 20):
    """AffineFlow.forward: returns (mu + exp(log_sigma) * z, log_sigma)."""
    orig_shape = z.shape
    dtype = z.dtype
    itemsize = dtype.itemsize
    n = z.size

    # Scalars (shape (1,)) for SMEM; exp is hoisted out of the kernel.
    mu_s = jnp.reshape(mu, (1,))
    scale_s = jnp.exp(jnp.reshape(log_sigma, (1,)))

    # ---- Flatten to a lane-dense slab and pick a ~2 MiB tile. ----
    sublane = 16 if itemsize == 2 else 8          # bf16 packs rows in pairs
    rows = pl.cdiv(n, slab_cols)                  # logical rows needed
    rows_min = pl.cdiv(rows, sublane) * sublane   # rows rounded to sublane

    tile_rows = (target_tile_bytes // (slab_cols * itemsize)) // sublane * sublane
    tile_rows = max(sublane, tile_rows)
    tile_rows = min(tile_rows, rows_min)          # don't over-pad tiny inputs

    grid_n = pl.cdiv(rows, tile_rows)
    rows_padded = grid_n * tile_rows
    n_padded = rows_padded * slab_cols

    flat = jnp.ravel(z)
    if n_padded != n:
        flat = jnp.pad(flat, (0, n_padded - n))
    slab = flat.reshape(rows_padded, slab_cols)

    smem = pl.BlockSpec(memory_space=pltpu.MemorySpace.SMEM)

    x_slab = pl.pallas_call(
        affine_flow_kernel,
        out_shape=jax.ShapeDtypeStruct((rows_padded, slab_cols), dtype),
        grid=(grid_n,),
        in_specs=[
            smem,                                              # mu     (1,) scalar
            smem,                                              # scale  (1,) scalar
            pl.BlockSpec((tile_rows, slab_cols), lambda i: (i, 0)),  # z tile
        ],
        out_specs=pl.BlockSpec((tile_rows, slab_cols), lambda i: (i, 0)),
        compiler_params=pltpu.CompilerParams(
            dimension_semantics=("parallel",),   # shard tiles across TensorCores
        ),
        cost_estimate=pl.CostEstimate(
            flops=2 * n_padded,                  # one mul + one add per elem
            transcendentals=0,                   # exp hoisted to the wrapper
            bytes_accessed=2 * n_padded * itemsize,  # read z, write x
        ),
    )(mu_s, scale_s, slab)

    x = x_slab.reshape(-1)[:n].reshape(orig_shape)

    # logJ = log_sigma (scalar, independent of z) -- matches the PyTorch module.
    logJ = jnp.squeeze(log_sigma)
    return x, logJ


if __name__ == "__main__":
    # Small shapes consistent with the module: batch=16, feature dim=256.
    B, D = 16, 256
    mu_val, sigma_val = 0.5, 1.7

    key = jax.random.PRNGKey(0)
    z = jax.random.normal(key, (B, D), dtype=jnp.float32)

    # Module parameters: mu * ones(1), log(sigma * ones(1))
    mu = jnp.full((1,), mu_val, dtype=jnp.float32)
    log_sigma = jnp.log(jnp.full((1,), sigma_val, dtype=jnp.float32))

    x, logJ = affine_flow_forward(z, mu, log_sigma)
    jax.block_until_ready((x, logJ))

    # Pure-JAX reference (same math as the PyTorch forward).
    x_ref = mu_val + jnp.exp(log_sigma[0]) * z
    logJ_ref = log_sigma[0]
    assert x.shape == z.shape
    assert jnp.allclose(x, x_ref, atol=1e-6, rtol=1e-6)
    assert jnp.allclose(logJ, logJ_ref)

    print("KERNEL_OK")
</pallas_src>

<mosaic_0001>
module attributes {stable_mosaic.version = 11 : i64} {
  func.func @affine_flow_kernel(%arg0: i32, %arg1: memref<1xf32, #tpu.memory_space<smem>>, %arg2: memref<1xf32, #tpu.memory_space<smem>>, %arg3: memref<8x2048xf32, #tpu.memory_space<vmem>>, %arg4: memref<8x2048xf32, #tpu.memory_space<vmem>>) attributes {dimension_semantics = [#tpu.dimension_semantics<parallel>], iteration_bounds = array<i64: 1>, scalar_prefetch = 0 : i64, scratch_operands = 0 : i64, tpu.core_type = #tpu.core_type<tc>, window_params = [{transform_indices = @transform_0, window_bounds = array<i64: 1>}, {transform_indices = @transform_1, window_bounds = array<i64: 1>}, {transform_indices = @transform_2, window_bounds = array<i64: 8, 2048>}, {transform_indices = @transform_3, window_bounds = array<i64: 8, 2048>}]} {
    %c0 = arith.constant 0 : index
    %0 = memref.load %arg1[%c0] : memref<1xf32, #tpu.memory_space<smem>>
    %c0_0 = arith.constant 0 : index
    %1 = memref.load %arg2[%c0_0] : memref<1xf32, #tpu.memory_space<smem>>
    %c0_1 = arith.constant 0 : index
    %c0_2 = arith.constant 0 : index
    %2 = vector.load %arg3[%c0_1, %c0_2] : memref<8x2048xf32, #tpu.memory_space<vmem>>, vector<8x2048xf32>
    %3 = vector.broadcast %1 : f32 to vector<8x2048xf32>
    %4 = arith.mulf %3, %2 : vector<8x2048xf32>
    %5 = vector.broadcast %0 : f32 to vector<8x2048xf32>
    %6 = arith.addf %5, %4 : vector<8x2048xf32>
    %c0_3 = arith.constant 0 : index
    %c0_4 = arith.constant 0 : index
    %7 = vector.load %arg4[%c0_3, %c0_4] : memref<8x2048xf32, #tpu.memory_space<vmem>>, vector<8x2048xf32>
    tpu.vector_store %arg4[%c0_3, %c0_4], %6 {strides = array<i32>} : memref<8x2048xf32, #tpu.memory_space<vmem>>, vector<8x2048xf32>,
    return
  }
  func.func @transform_0(%arg0: i32) -> i32 {
    %c0_i32 = arith.constant 0 : i32
    %c0_i32_0 = arith.constant 0 : i32
    return %c0_i32 : i32
  }
  func.func @transform_1(%arg0: i32) -> i32 {
    %c0_i32 = arith.constant 0 : i32
    %c0_i32_0 = arith.constant 0 : i32
    return %c0_i32 : i32
  }
  func.func @transform_2(%arg0: i32) -> (i32, i32) {
    %c0_i32 = arith.constant 0 : i32
    %c0_i32_0 = arith.constant 0 : i32
    return %arg0, %c0_i32 : i32, i32
  }
  func.func @transform_3(%arg0: i32) -> (i32, i32) {
    %c0_i32 = arith.constant 0 : i32
    %c0_i32_0 = arith.constant 0 : i32
    return %arg0, %c0_i32 : i32, i32
  }
}

</mosaic_0001>

<bundles_post_ra>
// kernel: tpu_custom_call.1
= control target key start
LH: loop header
LB: loop body
LE: loop exit
PB: predicated region body
PF: predicated region fallthrough
CT: control target
= control target key end

     0   :  { %10 = vsyncpa [#allocation5], 0  ;;  %s204_s0 = inlined_call_operand.<no memory space> [shape: f32[1], index: 0, kind: input, shape index: {}]   ;;  %s205_s1 = inlined_call_operand.<no memory space> [shape: f32[1], index: 1, kind: input, shape index: {}]   ;;  %s206_s2 = inlined_call_operand.hbm [shape: f32[8,2048], index: 2, kind: input, shape index: {}]   ;;  %s207_s3 = inlined_call_operand.hbm [shape: f32[8,2048], index: 3, kind: output, shape index: {}]  }
   0x1   :  { %11 = vsyncpa [#allocation6], 0  ;;  %s21_s14 = sshll.u32 %s206_s2, 4  ;;  %s170_s15 = smov [#allocation4]   ;;  %s22_s14 = int_to_ptr.hbm [resolvable:$true] %s21_s14 }
   0x2   :  { %s23_s16 = sshll.u32 %s170_s15, 4  ;;  %s24_s16 = int_to_ptr.vmem [resolvable:$true] %s23_s16 }
   0x3   :  { %26 = dma.hbm_to_vmem [thread:$0]  %s22_s14, 2048, %s24_s16, [#allocation5]  }
   0x4   :  { %166 = dma.done.wait [#allocation5], 2048  }
   0x5   :  { %167 = vsyncadd [#allocation5], 4294965248  ;;  %v49_v0 = vstv %s205_s1  ;;  %v33_v1 = vld [vmem:[#allocation4] sm:$0xff]  ;;  %v66_v2 = vstv %s204_s0  ;;  %v34_v3 = vld [vmem:[#allocation4 + $0x8] sm:$0xff]  ;;  %s171_s0 = smov [#allocation7]   ;;  %s106_s22 = sshll.u32 %s207_s3, 4  ;;  %s107_s22 = int_to_ptr.hbm [resolvable:$true] %s106_s22 }
   0x6   :  { %v35_v4 = vld [vmem:[#allocation4 + $0x10] sm:$0xff]  ;;  %v50_v5 = vmul.f32 %v49_v0, %v33_v1  ;;  %v51_v6 = vmul.f32 %v49_v0, %v34_v3  ;;  %v36_v8 = vld [vmem:[#allocation4 + $0x18] sm:$0xff]  ;;  %v37_v9 = vld [vmem:[#allocation4 + $0x20] sm:$0xff]  ;;  %s104_s1 = sshll.u32 %s171_s0, 4  ;;  %s105_s1 = int_to_ptr.vmem [resolvable:$true] %s104_s1 }
   0x7   :  { %v52_v7 = vmul.f32 %v49_v0, %v35_v4  ;;  %v38_v10 = vld [vmem:[#allocation4 + $0x28] sm:$0xff]  ;;  %v53_v11 = vmul.f32 %v49_v0, %v36_v8  ;;  %v54_v12 = vmul.f32 %v49_v0, %v37_v9  ;;  %v39_v14 = vld [vmem:[#allocation4 + $0x30] sm:$0xff]  ;;  %v40_v15 = vld [vmem:[#allocation4 + $0x38] sm:$0xff] }
   0x8   :  { %v55_v13 = vmul.f32 %v49_v0, %v38_v10  ;;  %v41_v16 = vld [vmem:[#allocation4 + $0x40] sm:$0xff]  ;;  %v67_v17 = vadd.f32 %v66_v2, %v50_v5  ;;  %v68_v18 = vadd.f32 %v66_v2, %v51_v6  ;;  %v56_v20 = vmul.f32 %v49_v0, %v39_v14  ;;  %v42_v21 = vld [vmem:[#allocation4 + $0x48] sm:$0xff]  ;;  %v43_v24 = vld [vmem:[#allocation4 + $0x50] sm:$0xff] }
   0x9   :  { %v69_v19 = vadd.f32 %v66_v2, %v52_v7  ;;  %v70_v22 = vadd.f32 %v66_v2, %v53_v11  ;;  %v57_v23 = vmul.f32 %v49_v0, %v40_v15  ;;  %v71_v25 = vadd.f32 %v66_v2, %v54_v12  ;;  %v44_v27 = vld [vmem:[#allocation4 + $0x58] sm:$0xff]  ;;  %v45_v30 = vld [vmem:[#allocation4 + $0x60] sm:$0xff]  ;;  %v46_v33 = vld [vmem:[#allocation4 + $0x68] sm:$0xff] }
   0xa   :  { %83 = vst [vmem:[#allocation7] sm:$0xff] %v67_v17  ;;  %v58_v26 = vmul.f32 %v49_v0, %v41_v16  ;;  %v72_v28 = vadd.f32 %v66_v2, %v55_v13  ;;  %v59_v29 = vmul.f32 %v49_v0, %v42_v21  ;;  %v73_v31 = vadd.f32 %v66_v2, %v56_v20  ;;  %v47_v36 = vld [vmem:[#allocation4 + $0x70] sm:$0xff]  ;;  %v48_v39 = vld [vmem:[#allocation4 + $0x78] sm:$0xff] }
   0xb   :  { %84 = vst [vmem:[#allocation7 + $0x8] sm:$0xff] %v68_v18  ;;  %v60_v32 = vmul.f32 %v49_v0, %v43_v24  ;;  %v74_v34 = vadd.f32 %v66_v2, %v57_v23  ;;  %v61_v35 = vmul.f32 %v49_v0, %v44_v27  ;;  %v62_v38 = vmul.f32 %v49_v0, %v45_v30 }
   0xc   :  { %85 = vst [vmem:[#allocation7 + $0x10] sm:$0xff] %v69_v19  ;;  %v75_v37 = vadd.f32 %v66_v2, %v58_v26  ;;  %v76_v40 = vadd.f32 %v66_v2, %v59_v29  ;;  %v63_v41 = vmul.f32 %v49_v0, %v46_v33  ;;  %v64_v43 = vmul.f32 %v49_v0, %v47_v36 }
   0xd   :  { %86 = vst [vmem:[#allocation7 + $0x18] sm:$0xff] %v70_v22  ;;  %v77_v42 = vadd.f32 %v66_v2, %v60_v32  ;;  %v78_v44 = vadd.f32 %v66_v2, %v61_v35  ;;  %v65_v45 = vmul.f32 %v49_v0, %v48_v39  ;;  %v79_v46 = vadd.f32 %v66_v2, %v62_v38 }
   0xe   :  { %87 = vst [vmem:[#allocation7 + $0x20] sm:$0xff] %v71_v25  ;;  %v80_v47 = vadd.f32 %v66_v2, %v63_v41  ;;  %v81_v48 = vadd.f32 %v66_v2, %v64_v43 }
   0xf   :  { %88 = vst [vmem:[#allocation7 + $0x28] sm:$0xff] %v72_v28  ;;  %v82_v49 = vadd.f32 %v66_v2, %v65_v45 }
  0x10   :  { %89 = vst [vmem:[#allocation7 + $0x30] sm:$0xff] %v73_v31 }
  0x11   :  { %90 = vst [vmem:[#allocation7 + $0x38] sm:$0xff] %v74_v34 }
  0x12   :  { %91 = vst [vmem:[#allocation7 + $0x40] sm:$0xff] %v75_v37 }
  0x13   :  { %92 = vst [vmem:[#allocation7 + $0x48] sm:$0xff] %v76_v40 }
  0x14   :  { %93 = vst [vmem:[#allocation7 + $0x50] sm:$0xff] %v77_v42 }
  0x15   :  { %94 = vst [vmem:[#allocation7 + $0x58] sm:$0xff] %v78_v44 }
  0x16   :  { %95 = vst [vmem:[#allocation7 + $0x60] sm:$0xff] %v79_v46 }
  0x17   :  { %96 = vst [vmem:[#allocation7 + $0x68] sm:$0xff] %v80_v47 }
  0x18   :  { %97 = vst [vmem:[#allocation7 + $0x70] sm:$0xff] %v81_v48 }
  0x19   :  { %98 = vst [vmem:[#allocation7 + $0x78] sm:$0xff] %v82_v49 }
  0x1a   :  { %109 = dma.vmem_to_hbm [thread:$0]  %s105_s1, 2048, %s107_s22, [#allocation6]  }
  0x1b   :  { %168 = dma.done.wait [#allocation6], 2048  }
  0x1c   :  { %169 = vsyncadd [#allocation6], 4294965248 }
  0x1d   :  { %114 = vsyncpa [#allocation5], 1 }
  0x1e   :  { %115 = vsyncpa [#allocation6], 1 }

</bundles_post_ra>
